<compile_context>
chip_gen: v7x
topology: tpu7x:2x2x1
jax: 0.10.0
libtpu: 0.0.40
codegen_flags: <defaults>
</compile_context>

<pallas_src>
import jax
import jax.numpy as jnp
import numpy as np
from jax.experimental import pallas as pl
from jax.experimental.pallas import tpu as pltpu

LN_EPS = 1e-5   # torch.nn.LayerNorm default eps


def _round_up(x, m):
    return ((x + m - 1) // m) * m


# ---------------------------------------------------------------------------
# Per-generation VMEM budgeting
# ---------------------------------------------------------------------------
def _vmem_capacity_bytes():
    try:
        info = pltpu.get_tpu_info()
        for name in ("vmem_capacity_bytes", "vmem_bytes", "vmem_size_bytes"):
            v = getattr(info, name, None)
            if v:
                return int(v)
    except Exception:
        pass
    return 64 << 20          # conservative fallback (v7x-sized VMEM)


def _pick_vmem_limit():
    cap = _vmem_capacity_bytes()
    if cap >= (100 << 20):               # v5e / v6e: 128 MiB physical VMEM
        return 64 << 20
    return min(48 << 20, (cap * 3) // 4)  # v7x: 64 MiB physical -> ~48 MiB scoped


def _choose_pair_row_tile(Np, Nc, H, P, vmem_budget_bytes):
    """Largest row tile TNp (multiple of 8) whose working set fits the VMEM budget.

    Conservative per-row f32 model:
      output tile x2 (double buffer) + pre-mask matmul temp    -> 3*Nc*P
      broadcast product + flat (TNp*Nc, H) view                -> 2*Nc*H
      p_h tile x2                                              -> 2*H
    Prefers a tile that divides round_up(Np, 8) exactly so the output needs no
    padding/slice along Np (always true for production Np=512).
    """
    per_row = 4 * (3 * Nc * P + 2 * Nc * H + 2 * H)
    fixed = 4 * (2 * Nc * H + 2 * H * P + 4 * P + 4 * Nc)   # c_h, wo, bo, masks
    budget = max(vmem_budget_bytes - fixed, 8 * per_row)
    tnp_max = max((int(budget) // per_row) // 8 * 8, 8)
    tnp_max = min(tnp_max, 512)

    np8 = _round_up(Np, 8)
    if tnp_max >= np8:
        return np8, np8                  # whole (8-padded) Np in one tile
    for t in range(tnp_max, 7, -8):      # largest multiple of 8 dividing np8
        if np8 % t == 0:
            return t, np8
    return tnp_max, _round_up(Np, tnp_max)   # defensive; unreachable (8 | np8)


def _divisor_tile(n, prefs=(256, 128, 64)):
    """Row tile for the projection kernel: a nice divisor of n, else full extent."""
    for t in prefs:
        if n >= t and n % t == 0:
            return t
    return n


# ---------------------------------------------------------------------------
# Kernel 1: LayerNorm + Linear (one (1, T, D) row tile per grid step)
# ---------------------------------------------------------------------------
def _ln_linear_kernel(x_ref, g_ref, b_ref, w_ref, bw_ref, y_ref):
    x = x_ref[0]                                            # (T, D)
    mu = jnp.mean(x, axis=-1, keepdims=True)
    xc = x - mu
    var = jnp.mean(xc * xc, axis=-1, keepdims=True)
    xn = xc * jax.lax.rsqrt(var + LN_EPS) * g_ref[...] + b_ref[...]
    y_ref[0] = jnp.dot(xn, w_ref[...], preferred_element_type=jnp.float32) + bw_ref[...]


def _project(x, gamma, beta, w, bw, rows_pad, row_tile, vmem_limit):
    B, N, D = x.shape
    H = w.shape[1]
    if rows_pad != N:
        x = jnp.pad(x, ((0, 0), (0, rows_pad - N), (0, 0)))
    n_tiles = rows_pad // row_tile
    return pl.pallas_call(
        _ln_linear_kernel,
        out_shape=jax.ShapeDtypeStruct((B, rows_pad, H), jnp.float32),
        grid=(B, n_tiles),
        in_specs=[
            pl.BlockSpec((1, row_tile, D), lambda b, i: (b, i, 0)),   # x rows
            pl.BlockSpec((1, D), lambda b, i: (0, 0)),                # gamma
            pl.BlockSpec((1, D), lambda b, i: (0, 0)),                # beta
            pl.BlockSpec((D, H), lambda b, i: (0, 0)),                # W
            pl.BlockSpec((1, H), lambda b, i: (0, 0)),                # bias
        ],
        out_specs=pl.BlockSpec((1, row_tile, H), lambda b, i: (b, i, 0)),
        compiler_params=pltpu.CompilerParams(
            dimension_semantics=("parallel", "parallel"),
            vmem_limit_bytes=vmem_limit),
    )(x, gamma, beta, w, bw)


# ---------------------------------------------------------------------------
# Kernel 2: one (TNp, Nc, P) pair tile per grid step (full Nc / P span)
# ---------------------------------------------------------------------------
def _pair_kernel(ph_ref, ch_ref, pm_ref, cm_ref, wo_ref, bo_ref, out_ref):
    p_h = ph_ref[0]                                   # (TNp, H)
    c_h = ch_ref[0]                                   # (Nc,  H)
    tnp, h = p_h.shape
    nc = c_h.shape[0]

    # einsum('ik,jk->ijk') for the tile; the collapse merges sublane-major dims only
    # (free when Nc is a multiple of 8, a cheap relayout otherwise — VPU/XLU work is
    # slack under the output-store DMA which is the roofline here).
    flat = (p_h[:, None, :] * c_h[None, :, :]).reshape(tnp * nc, h)

    # linear_out on the MXU: tall M = TNp*Nc, f32 accumulation.
    out = jnp.dot(flat, wo_ref[...], preferred_element_type=jnp.float32) + bo_ref[...]

    # inter_mask tile: (TNp,1) * (1,Nc) -> (TNp,Nc); no cross-lane transpose.
    mask2d = pm_ref[0] * cm_ref[0]

    out = out.reshape(tnp, nc, -1) * mask2d[:, :, None]
    out_ref[0] = out.astype(out_ref.dtype)            # optional bf16 store


# ---------------------------------------------------------------------------
# Parameter init (torch nn.Linear-style uniform +/- 1/sqrt(fan_in))
# ---------------------------------------------------------------------------
def init_params(key, node_hidden_dim, pair_hidden_dim, hidden_dim):
    ks = jax.random.split(key, 6)

    def linear(kw, kb, fan_in, fan_out):
        bound = 1.0 / np.sqrt(fan_in)
        w = jax.random.uniform(kw, (fan_in, fan_out), jnp.float32, -bound, bound)
        b = jax.random.uniform(kb, (1, fan_out), jnp.float32, -bound, bound)
        return w, b

    wp, bp = linear(ks[0], ks[1], node_hidden_dim, hidden_dim)
    wc, bc = linear(ks[2], ks[3], node_hidden_dim, hidden_dim)
    wo, bo = linear(ks[4], ks[5], hidden_dim, pair_hidden_dim)
    gamma_p = jnp.ones((1, node_hidden_dim), jnp.float32)
    beta_p = jnp.zeros((1, node_hidden_dim), jnp.float32)
    gamma_c = jnp.ones((1, node_hidden_dim), jnp.float32)
    beta_c = jnp.zeros((1, node_hidden_dim), jnp.float32)
    return dict(gamma_p=gamma_p, beta_p=beta_p, gamma_c=gamma_c, beta_c=beta_c,
                wp=wp, bp=bp, wc=wc, bc=bc, wo=wo, bo=bo)


# ---------------------------------------------------------------------------
# Forward wrapper
# ---------------------------------------------------------------------------
def interaction_forward(p_embed, c_embed, params, p_mask=None, c_mask=None,
                        out_dtype=jnp.float32):
    B, Np, D = p_embed.shape
    _, Nc, _ = c_embed.shape
    H = params["wp"].shape[1]
    P = params["wo"].shape[1]

    if p_mask is None:
        p_mask = jnp.ones((B, Np), dtype=bool)
    if c_mask is None:
        c_mask = jnp.ones((B, Nc), dtype=bool)
    inter_mask = p_mask[:, :, None] & c_mask[:, None, :]          # (B, Np, Nc) bool

    vmem_limit = _pick_vmem_limit()
    TNp, Np_pad = _choose_pair_row_tile(Np, Nc, H, P, int(vmem_limit * 0.9))

    # ---- Kernel 1: LN + projections (row-tiled so v7x's 2 TCs both work at B=1) ----
    p_h = _project(p_embed, params["gamma_p"], params["beta_p"],
                   params["wp"], params["bp"], Np_pad, TNp, vmem_limit)
    c_h = _project(c_embed, params["gamma_c"], params["beta_c"],
                   params["wc"], params["bc"], Nc, _divisor_tile(Nc), vmem_limit)

    # Masks as f32: padded p rows carry a zero mask so the linear_out bias never leaks.
    pm_f = p_mask.astype(jnp.float32)
    if Np_pad != Np:
        pm_f = jnp.pad(pm_f, ((0, 0), (0, Np_pad - Np)))
    pm_f = pm_f[:, :, None]                                       # (B, Np_pad, 1)
    cm_f = c_mask.astype(jnp.float32)[:, None, :]                 # (B, 1, Nc)

    # ---- Kernel 2: pair tiles; output written at exact (Nc, P) extent ---------------
    nP = Np_pad // TNp
    out = pl.pallas_call(
        _pair_kernel,
        out_shape=jax.ShapeDtypeStruct((B, Np_pad, Nc, P), out_dtype),
        grid=(B, nP),
        in_specs=[
            pl.BlockSpec((1, TNp, H), lambda b, i: (b, i, 0)),    # p_h row tile
            pl.BlockSpec((1, Nc, H), lambda b, i: (b, 0, 0)),     # c_h (resident per b)
            pl.BlockSpec((1, TNp, 1), lambda b, i: (b, i, 0)),    # p_mask (sublane-major)
            pl.BlockSpec((1, 1, Nc), lambda b, i: (b, 0, 0)),     # c_mask (lane-major)
            pl.BlockSpec((H, P), lambda b, i: (0, 0)),            # wo (resident)
            pl.BlockSpec((1, P), lambda b, i: (0, 0)),            # bo
        ],
        out_specs=pl.BlockSpec((1, TNp, Nc, P), lambda b, i: (b, i, 0, 0)),
        compiler_params=pltpu.CompilerParams(
            dimension_semantics=("parallel", "parallel"),
            vmem_limit_bytes=vmem_limit),
    )(p_h, c_h, pm_f, cm_f, params["wo"], params["bo"])

    if Np_pad != Np:                    # only when Np is not a multiple of 8
        out = out[:, :Np]
    return out, inter_mask


# ---------------------------------------------------------------------------
# Pure-JAX reference mirroring the PyTorch forward (opm=False)
# ---------------------------------------------------------------------------
def _reference_forward(p_embed, c_embed, params, p_mask, c_mask):
    def ln(x, g, b):
        mu = jnp.mean(x, axis=-1, keepdims=True)
        var = jnp.mean((x - mu) ** 2, axis=-1, keepdims=True)
        return (x - mu) / jnp.sqrt(var + LN_EPS) * g + b

    inter_mask = p_mask[:, :, None] & c_mask[:, None, :]
    p = ln(p_embed, params["gamma_p"], params["beta_p"])
    c = ln(c_embed, params["gamma_c"], params["beta_c"])
    p_h = jnp.einsum("bnd,dh->bnh", p, params["wp"], precision="highest") + params["bp"]
    c_h = jnp.einsum("bnd,dh->bnh", c, params["wc"], precision="highest") + params["bc"]
    inter = jnp.einsum("bik,bjk->bijk", p_h, c_h, precision="highest")
    out = jnp.einsum("bijh,hp->bijp", inter, params["wo"], precision="highest") + params["bo"]
    out = out * inter_mask[..., None].astype(out.dtype)
    return out, inter_mask


if __name__ == "__main__":
    # Small shapes consistent with the module (exercise masking + unaligned P/Nc).
    B, Np, Nc = 2, 24, 40
    node_hidden_dim, hidden_dim, pair_hidden_dim = 32, 16, 32

    key = jax.random.PRNGKey(0)
    k_p, k_c, k_pm, k_cm, k_params = jax.random.split(key, 5)

    p_embed = jax.random.normal(k_p, (B, Np, node_hidden_dim), jnp.float32)
    c_embed = jax.random.normal(k_c, (B, Nc, node_hidden_dim), jnp.float32)
    p_mask = jax.random.bernoulli(k_pm, 0.85, (B, Np))
    c_mask = jax.random.bernoulli(k_cm, 0.85, (B, Nc))
    params = init_params(k_params, node_hidden_dim, pair_hidden_dim, hidden_dim)

    # Explicit-mask path (f32 output)
    inter_embed, inter_mask = interaction_forward(p_embed, c_embed, params, p_mask, c_mask)
    jax.block_until_ready(inter_embed)
    jax.block_until_ready(inter_mask)

    ref_embed, ref_mask = _reference_forward(p_embed, c_embed, params, p_mask, c_mask)
    np.testing.assert_allclose(np.asarray(inter_embed), np.asarray(ref_embed),
                               rtol=1e-5, atol=1e-5)
    np.testing.assert_array_equal(np.asarray(inter_mask), np.asarray(ref_mask))
    assert inter_embed.shape == (B, Np, Nc, pair_hidden_dim)
    assert inter_mask.shape == (B, Np, Nc) and inter_mask.dtype == jnp.bool_

    # Default (mask=None) path
    inter_embed2, inter_mask2 = interaction_forward(p_embed, c_embed, params)
    jax.block_until_ready(inter_embed2)
    ref_embed2, ref_mask2 = _reference_forward(
        p_embed, c_embed, params,
        jnp.ones((B, Np), dtype=bool), jnp.ones((B, Nc), dtype=bool))
    np.testing.assert_allclose(np.asarray(inter_embed2), np.asarray(ref_embed2),
                               rtol=1e-5, atol=1e-5)
    np.testing.assert_array_equal(np.asarray(inter_mask2), np.asarray(ref_mask2))

    # bf16-output path (halves HBM writeback, the roofline on every generation)
    inter_bf16, _ = interaction_forward(p_embed, c_embed, params, p_mask, c_mask,
                                        out_dtype=jnp.bfloat16)
    jax.block_until_ready(inter_bf16)
    assert inter_bf16.dtype == jnp.bfloat16
    np.testing.assert_allclose(np.asarray(inter_bf16).astype(np.float32),
                               np.asarray(ref_embed), rtol=3e-2, atol=3e-2)

    print("KERNEL_OK")
</pallas_src>

<mosaic_0001>
module attributes {stable_mosaic.version = 11 : i64} {
  func.func @_ln_linear_kernel(%arg0: i32, %arg1: i32, %arg2: memref<1x24x32xf32, #tpu.memory_space<vmem>>, %arg3: memref<1x32xf32, #tpu.memory_space<vmem>>, %arg4: memref<1x32xf32, #tpu.memory_space<vmem>>, %arg5: memref<32x16xf32, #tpu.memory_space<vmem>>, %arg6: memref<1x16xf32, #tpu.memory_space<vmem>>, %arg7: memref<1x24x16xf32, #tpu.memory_space<vmem>>) attributes {dimension_semantics = [#tpu.dimension_semantics<parallel>, #tpu.dimension_semantics<parallel>], iteration_bounds = array<i64: 2, 1>, scalar_prefetch = 0 : i64, scratch_operands = 0 : i64, tpu.core_type = #tpu.core_type<tc>, window_params = [{transform_indices = @transform_0, window_bounds = array<i64: 1, 24, 32>}, {pipeline_mode = #tpu.pipeline_mode<synchronous>, transform_indices = @transform_1, window_bounds = array<i64: 1, 32>}, {pipeline_mode = #tpu.pipeline_mode<synchronous>, transform_indices = @transform_2, window_bounds = array<i64: 1, 32>}, {pipeline_mode = #tpu.pipeline_mode<synchronous>, transform_indices = @transform_3, window_bounds = array<i64: 32, 16>}, {pipeline_mode = #tpu.pipeline_mode<synchronous>, transform_indices = @transform_4, window_bounds = array<i64: 1, 16>}, {transform_indices = @transform_5, window_bounds = array<i64: 1, 24, 16>}]} {
    %c0 = arith.constant 0 : index
    %c0_0 = arith.constant 0 : index
    %c0_1 = arith.constant 0 : index
    %0 = vector.load %arg2[%c0, %c0_0, %c0_1] : memref<1x24x32xf32, #tpu.memory_space<vmem>>, vector<1x24x32xf32>
    %1 = vector.shape_cast %0 : vector<1x24x32xf32> to vector<24x32xf32>
    %cst = arith.constant dense<0.000000e+00> : vector<24xf32>
    %2 = vector.multi_reduction <add>, %1, %cst [1] : vector<24x32xf32> to vector<24xf32>
    %3 = vector.shape_cast %2 : vector<24xf32> to vector<24x1xf32>
    %cst_2 = arith.constant 3.200000e+01 : f32
    %4 = vector.broadcast %cst_2 : f32 to vector<24x1xf32>
    %5 = arith.divf %3, %4 : vector<24x1xf32>
    %6 = vector.broadcast %5 : vector<24x1xf32> to vector<24x32xf32>
    %7 = arith.subf %1, %6 : vector<24x32xf32>
    %8 = arith.mulf %7, %7 : vector<24x32xf32>
    %cst_3 = arith.constant dense<0.000000e+00> : vector<24xf32>
    %9 = vector.multi_reduction <add>, %8, %cst_3 [1] : vector<24x32xf32> to vector<24xf32>
    %10 = vector.shape_cast %9 : vector<24xf32> to vector<24x1xf32>
    %cst_4 = arith.constant 3.200000e+01 : f32
    %11 = vector.broadcast %cst_4 : f32 to vector<24x1xf32>
    %12 = arith.divf %10, %11 : vector<24x1xf32>
    %cst_5 = arith.constant 9.99999974E-6 : f32
    %13 = vector.broadcast %cst_5 : f32 to vector<24x1xf32>
    %14 = arith.addf %12, %13 : vector<24x1xf32>
    %15 = math.rsqrt %14 : vector<24x1xf32>
    %16 = vector.broadcast %15 : vector<24x1xf32> to vector<24x32xf32>
    %17 = arith.mulf %7, %16 : vector<24x32xf32>
    %c0_6 = arith.constant 0 : index
    %c0_7 = arith.constant 0 : index
    %18 = vector.load %arg3[%c0_6, %c0_7] : memref<1x32xf32, #tpu.memory_space<vmem>>, vector<1x32xf32>
    %19 = vector.broadcast %18 : vector<1x32xf32> to vector<24x32xf32>
    %20 = arith.mulf %17, %19 : vector<24x32xf32>
    %c0_8 = arith.constant 0 : index
    %c0_9 = arith.constant 0 : index
    %21 = vector.load %arg4[%c0_8, %c0_9] : memref<1x32xf32, #tpu.memory_space<vmem>>, vector<1x32xf32>
    %22 = vector.broadcast %21 : vector<1x32xf32> to vector<24x32xf32>
    %23 = arith.addf %20, %22 : vector<24x32xf32>
    %c0_10 = arith.constant 0 : index
    %c0_11 = arith.constant 0 : index
    %24 = vector.load %arg5[%c0_10, %c0_11] : memref<32x16xf32, #tpu.memory_space<vmem>>, vector<32x16xf32>
    %cst_12 = arith.constant dense<0.000000e+00> : vector<24x16xf32>
    %25 = tpu.matmul %23, %24, %cst_12 {dimension_numbers = #tpu.dot_dimension_numbers<[1], [0], [0], [1], [0, 0, 1, 1], [], []>} : vector<24x32xf32>, vector<32x16xf32>, vector<24x16xf32> -> vector<24x16xf32>
    %c0_13 = arith.constant 0 : index
    %c0_14 = arith.constant 0 : index
    %26 = vector.load %arg6[%c0_13, %c0_14] : memref<1x16xf32, #tpu.memory_space<vmem>>, vector<1x16xf32>
    %27 = vector.broadcast %26 : vector<1x16xf32> to vector<24x16xf32>
    %28 = arith.addf %25, %27 : vector<24x16xf32>
    %c0_15 = arith.constant 0 : index
    %c0_16 = arith.constant 0 : index
    %c0_17 = arith.constant 0 : index
    %29 = vector.load %arg7[%c0_15, %c0_16, %c0_17] : memref<1x24x16xf32, #tpu.memory_space<vmem>>, vector<1x24x16xf32>
    %30 = vector.shape_cast %29 : vector<1x24x16xf32> to vector<24x16xf32>
    %31 = vector.shape_cast %28 : vector<24x16xf32> to vector<1x24x16xf32>
    tpu.vector_store %arg7[%c0_15, %c0_16, %c0_17], %31 {strides = array<i32>} : memref<1x24x16xf32, #tpu.memory_space<vmem>>, vector<1x24x16xf32>,
    return
  }
  func.func @transform_0(%arg0: i32, %arg1: i32) -> (i32, i32, i32) {
    %c0_i32 = arith.constant 0 : i32
    %c0_i32_0 = arith.constant 0 : i32
    return %arg0, %arg1, %c0_i32 : i32, i32, i32
  }
  func.func @transform_1(%arg0: i32, %arg1: i32) -> (i32, i32) {
    %c0_i32 = arith.constant 0 : i32
    %c0_i32_0 = arith.constant 0 : i32
    %c0_i32_1 = arith.constant 0 : i32
    return %c0_i32, %c0_i32_0 : i32, i32
  }
  func.func @transform_2(%arg0: i32, %arg1: i32) -> (i32, i32) {
    %c0_i32 = arith.constant 0 : i32
    %c0_i32_0 = arith.constant 0 : i32
    %c0_i32_1 = arith.constant 0 : i32
    return %c0_i32, %c0_i32_0 : i32, i32
  }
  func.func @transform_3(%arg0: i32, %arg1: i32) -> (i32, i32) {
    %c0_i32 = arith.constant 0 : i32
    %c0_i32_0 = arith.constant 0 : i32
    %c0_i32_1 = arith.constant 0 : i32
    return %c0_i32, %c0_i32_0 : i32, i32
  }
  func.func @transform_4(%arg0: i32, %arg1: i32) -> (i32, i32) {
    %c0_i32 = arith.constant 0 : i32
    %c0_i32_0 = arith.constant 0 : i32
    %c0_i32_1 = arith.constant 0 : i32
    return %c0_i32, %c0_i32_0 : i32, i32
  }
  func.func @transform_5(%arg0: i32, %arg1: i32) -> (i32, i32, i32) {
    %c0_i32 = arith.constant 0 : i32
    %c0_i32_0 = arith.constant 0 : i32
    return %arg0, %arg1, %c0_i32 : i32, i32, i32
  }
}

</mosaic_0001>

<bundles_post_ra>
// kernel: tpu_custom_call.1
= control target key start
LH: loop header
LB: loop body
LE: loop exit
PB: predicated region body
PF: predicated region fallthrough
CT: control target
= control target key end

     0   :  { %s659_s18 = smov 0   ;;  %s661_s19 = smov 0   ;;  %s732_s0 = inlined_call_operand.vmem [shape: f32[2,24,32], index: 0, kind: input, shape index: {}]   ;;  %s733_s1 = inlined_call_operand.vmem [shape: f32[1,32], index: 1, kind: input, shape index: {}]   ;;  %s734_s2 = inlined_call_operand.vmem [shape: f32[1,32], index: 2, kind: input, shape index: {}]   ;;  %s735_s3 = inlined_call_operand.vmem [shape: f32[32,16], index: 3, kind: input, shape index: {}]   ;;  %s736_s4 = inlined_call_operand.vmem [shape: f32[1,16], index: 4, kind: input, shape index: {}]   ;;  %s737_s5 = inlined_call_operand.vmem [shape: f32[2,24,16], index: 5, kind: output, shape index: {}]  }
   0x1   :  { %s663_s20 = smov 0  }
   0x2 LB: > { %s27_s21 = sadd.s32 1, %s620_s19  ;;  %p523_p0 = scmp.ge.s32.totalorder %s624_s20, 1  ;;  %s624_s20 = sphi %s663_s20, %s15_s20   ;;  %s620_s19 = sphi %s661_s19, %s739_s19   ;;  %s616_s18 = sphi %s659_s18, %s738_s18  }
   0x3   : > { %p29_p1 = scmp.ge.s32.totalorder %s27_s21, 2  ;;  %p208_p2 = scmp.lt.s32.totalorder %s624_s20, 3 }
   0x5   : > { %s741_s21 = smov (%p29_p1, %s27_s21), 0  ;;  %p209_p3 = pnand %p523_p0, %p208_p2 }
   0x6   : > { %p245_p4 = scmp.lt.s32.totalorder (!%p209_p3), %s616_s18, 1  ;;  %vm267_vm0 = vcmask (!%p209_p3), 261120   ;;  %v328_v21 = vld [vmem:[%s735_s3] sm:$0xff] (!%p209_p3)  ;;  %v329_v22 = vld [vmem:[%s735_s3 + $0x8] sm:$0xff] (!%p209_p3)  ;;  %v330_v23 = vld [vmem:[%s735_s3 + $0x10] sm:$0xff] (!%p209_p3)  ;;  %v626_v24 = vmov (!%p209_p3), 0.0|0.0  }
   0x7   : > { %212 = sbr.rel (%p209_p3) target bundleno = 552 (0x228), region = 40  ;;  %564 = vmatprep.subr.bf16.mxu1 (!%p209_p3), %v626_v24  ;;  %v559_v25 = vpack.c.bf16 (!%p209_p3), %v329_v22, %v328_v21  ;;  %558 = vmatprep.subr.bf16.mxu0 (!%p209_p3), %v626_v24  ;;  %v331_v26 = vld [vmem:[%s735_s3 + $0x18] sm:$0xff] (!%p209_p3)  ;;  %vm627_vm1 = vmmov (!%p209_p3), 0   ;;  %v628_v27 = vmov (!%p209_p3), 0.0   ;;  %v526_v39 = vld [vmem:[%s733_s1] ss:$0 sm:$0xff] (!%p209_p3) }
   0x8   : > { %552 = vmatprep.mubr.msk.f32.mxu1 (!%p209_p3), %vm627_vm1, %v628_v27  ;;  %549 = vmatprep.mubr.msk.f32.mxu0 (!%p209_p3), %vm627_vm1, %v628_v27  ;;  %v562_v28 = vpack.c.bf16 (!%p209_p3), %v331_v26, %v330_v23  ;;  %v527_v41 = vld [vmem:[%s734_s2] ss:$0 sm:$0xff] (!%p209_p3)  ;;  %vm428_vm2 = vcmask (!%p209_p3), 130048  }
   0x9   : > { %566 = vmatpush3.bf16.msra.mxu1 (!%p209_p3), %v559_v25  ;;  %560 = vmatpush3.bf16.msra.mxu0 (!%p209_p3), %v559_v25  ;;  %v528_v52 = vld [vmem:[%s736_s4] ss:$0 sm:$0xff] (!%p209_p3) }
   0xa   : > { %565 = vmatprep.subr.bf16.mxu1 (!%p209_p3), %v626_v24  ;;  %561 = vmatprep.subr.bf16.mxu0 (!%p209_p3), %v626_v24 }
   0xd   : > { %567 = vmatpush3.bf16.msra.mxu1 (!%p209_p3), %v562_v28  ;;  %563 = vmatpush3.bf16.msra.mxu0 (!%p209_p3), %v562_v28 }
   0xe   : > { %s743_s18 = smov (!%p245_p4, %s616_s18), 1 }
   0xf   : > { %s568_s22 = smul.u32 24, %s743_s18 }
  0x11   : > { %s252_s25 = scalar_lea.vmem %s732_s0, %s568_s22  ;;  %s262_s17 = scalar_lea.vmem %s737_s5, %s568_s22 }
  0x12   : > { %v265_v0 = vld [vmem:[%s252_s25 + $0x8] sm:$0xff]  ;;  %v266_v1 = vld [vmem:[%s252_s25 + $0x10] sm:$0xff]  ;;  %v264_v2 = vld [vmem:[%s252_s25] sm:$0xff] }
  0x13   : > { %v271_v3 = vsel %vm267_vm0, %v265_v0, 0.0  ;;  %v274_v4 = vsel %vm267_vm0, %v266_v1, 0.0  ;;  %v268_v5 = vsel %vm267_vm0, %v264_v2, 0.0 }
  0x14   : > { %272 = vadd.xlane.f32.xlu0 %v271_v3  ;;  %275 = vadd.xlane.f32.xlu1 %v274_v4 }
  0x18   : > { %269 = vadd.xlane.f32.xlu0 %v268_v5 }
  0xa1   : > { %v273_v6 = vpop.xlane.xlu0 %272  ;;  %v276_v7 = vpop.xlane.xlu1 %275 }
  0xa2   : > { %v279_v8 = vmul.f32 0.03125, %v273_v6  ;;  %v280_v9 = vmul.f32 0.03125, %v276_v7 }
  0xa4   : > { %v282_v10 = vsub.f32 %v265_v0, %v279_v8  ;;  %v283_v11 = vsub.f32 %v266_v1, %v280_v9 }
  0xa5   : > { %v270_v12 = vpop.xlane.xlu0 %269 }
  0xa6   : > { %v278_v13 = vmul.f32 0.03125, %v270_v12  ;;  %v285_v14 = vmul.f32 %v282_v10, %v282_v10  ;;  %v286_v15 = vmul.f32 %v283_v11, %v283_v11 }
  0xa8   : > { %v281_v16 = vsub.f32 %v264_v2, %v278_v13  ;;  %v290_v17 = vsel %vm267_vm0, %v285_v14, 0.0  ;;  %v293_v18 = vsel %vm267_vm0, %v286_v15, 0.0 }
  0xa9   : > { %291 = vadd.xlane.f32.xlu1 %v290_v17 }
  0xaa   : > { %v284_v19 = vmul.f32 %v281_v16, %v281_v16 }
  0xac   : > { %v287_v20 = vsel %vm267_vm0, %v284_v19, 0.0 }
  0xad   : > { %294 = vadd.xlane.f32.xlu1 %v293_v18  ;;  %288 = vadd.xlane.f32.xlu0 %v287_v20 }
 0x136   : > { %v292_v29 = vpop.xlane.xlu1 %291 }
 0x137   : > { %v297_v30 = vmul.f32 0.03125, %v292_v29 }
 0x139   : > { %v300_v31 = vadd.f32 1e-05, %v297_v30 }
 0x13a   : > { %v295_v32 = vpop.xlane.xlu1 %294  ;;  %v289_v33 = vpop.xlane.xlu0 %288 }
 0x13b   : > { %596 = vrsqrt.f32 %v300_v31  ;;  %v298_v34 = vmul.f32 0.03125, %v295_v32  ;;  %v296_v35 = vmul.f32 0.03125, %v289_v33 }
 0x13d   : > { %v301_v36 = vadd.f32 1e-05, %v298_v34  ;;  %v299_v37 = vadd.f32 1e-05, %v296_v35 }
 0x13f   : > { %598 = vrsqrt.f32 %v301_v36 }
 0x140   : > { %600 = vrsqrt.f32 %v299_v37 }
 0x145   : > { %v597_v38 = vpop.eup %596 }
 0x146   : > { %v306_v40 = vmul.f32 %v597_v38, %v282_v10 }
 0x148   : > { %v316_v42 = vmul.f32 %v526_v39, %v306_v40 }
 0x149   : > { %v599_v43 = vpop.eup %598 }
 0x14a   : > { %v601_v44 = vpop.eup %600  ;;  %v326_v45 = vadd.f32 %v527_v41, %v316_v42  ;;  %v307_v46 = vmul.f32 %v599_v43, %v283_v11 }
 0x14b   : > { %v305_v47 = vmul.f32 %v601_v44, %v281_v16 }
 0x14c   : > { %553 = vmatmul.mubr.msk.f32.vlgmr.msra.gmra.mrb[0].mxu1 %vm267_vm0, %v326_v45  ;;  %v317_v48 = vmul.f32 %v526_v39, %v307_v46 }
 0x14d   : > { %555 = vmatprep.mubr.msk.f32.mxu1 %vm627_vm1, %v628_v27  ;;  %v315_v49 = vmul.f32 %v526_v39, %v305_v47 }
 0x14e   : > { %v327_v50 = vadd.f32 %v527_v41, %v317_v48 }
 0x14f   : > { %v325_v51 = vadd.f32 %v527_v41, %v315_v49 }
 0x150   : > { %556 = vmatmul.mubr.msk.f32.gmra.mrb[2].mxu1 %vm267_vm0, %v327_v50 }
 0x151   : > { %550 = vmatmul.mubr.msk.f32.vlgmr.msra.gmra.mrb[0].mxu0 %vm267_vm0, %v325_v51 }
 0x21f   : > { %v419_v53 = vpop.f32.mrb[0].mxu1 }
 0x220   : > { %v420_v54 = vadd.f32 %v528_v52, %v419_v53  ;;  %v554_v55 = vpop.f32.mrb[1].mxu1 }
 0x222   : > { %430 = vst.msk [vmem:[%s262_s17 + $0x8] sm:$0xff] %vm428_vm2, %v420_v54 }
 0x223   : > { %v424_v56 = vpop.f32.mrb[2].mxu1 }
 0x224   : > { %v414_v57 = vpop.f32.mrb[0].mxu0  ;;  %v425_v58 = vadd.f32 %v528_v52, %v424_v56  ;;  %v557_v59 = vpop.f32.mrb[3].mxu1 }
 0x225   : > { %v415_v60 = vadd.f32 %v528_v52, %v414_v57  ;;  %v551_v61 = vpop.f32.mrb[1].mxu0 }
 0x226   : > { %431 = vst.msk [vmem:[%s262_s17 + $0x10] sm:$0xff] %vm428_vm2, %v425_v58 }
 0x227   : > { %429 = vst.msk [vmem:[%s262_s17] sm:$0xff] %vm428_vm2, %v415_v60 }
 0x228 PF: > { %s15_s20 = sadd.s32 1, %s624_s20   ;;  %s738_s18 = smov %s620_s19 }
 0x229   : > { %p12_p5 = scmp.ge.s32.totalorder %s15_s20, 4   ;;  %s739_s19 = smov %s741_s21 }
 0x22b   :  { %14 = sbr.rel (!%p12_p5) target bundleno = 2 (0x2), region = 70 }

</bundles_post_ra>
